<compile_context>
chip_gen: v5e
topology: v5e:2x2
jax: 0.10.0
libtpu: 0.0.40
codegen_flags: <defaults>
</compile_context>

<pallas_src>
import functools

import jax
import jax.numpy as jnp
from jax import lax
from jax.experimental import pallas as pl
from jax.experimental.pallas import tpu as pltpu

_N_OUT = 8  # [bce_sum, sig_sum, dice_t_sum, inter_sum, mse_sum, 0, 0, 0]
_TARGET_BLOCK_BYTES = 1 << 20  # ~1 MiB per input per block (keeps 2x2 buffers + temps well under 32 MiB)


def _partials_kernel(x_ref, t_ref, out_ref, *, tile_r, tile_c, n_rows, n_cols,
                     n_channels, is_vectors, ragged_r, ragged_c):
    blk = (tile_r, tile_c)
    x = x_ref[...].astype(jnp.float32)
    t = t_ref[...].astype(jnp.float32)

    def _and(a, b):
        if a is None:
            return b
        if b is None:
            return a
        return jnp.logical_and(a, b)

    row_ids = None
    row_valid = None
    col_valid = None
    if ragged_r or is_vectors:
        row_ids = pl.program_id(0) * tile_r + lax.broadcasted_iota(jnp.int32, blk, 0)
    if ragged_r:
        row_valid = row_ids < n_rows
    if ragged_c:
        col_ids = pl.program_id(1) * tile_c + lax.broadcasted_iota(jnp.int32, blk, 1)
        col_valid = col_ids < n_cols

    valid = _and(row_valid, col_valid)
    if valid is not None:
        # Zero out-of-bounds garbage so no NaN/Inf can leak through the masks.
        x = jnp.where(valid, x, 0.0)
        t = jnp.where(valid, t, 0.0)

    if is_vectors:
        is_vec = (row_ids % n_channels) >= (n_channels - 2)
        seg_mask = _and(valid, jnp.logical_not(is_vec))
        vec_mask = _and(valid, is_vec)
    else:
        seg_mask = valid
        vec_mask = None

    # --- segmentation channels: BCE-with-logits + dice statistics -----------
    # One transcendental exp shared by softplus (BCE) and sigmoid (dice).
    e = jnp.exp(-jnp.abs(x))
    bce = jnp.maximum(x, 0.0) - x * t + jnp.log1p(e)
    # sigmoid(x) = [x>=0 ? 1 : e] / (1 + e).  (Exact divide to stay within the
    # 1e-5 check; switch to pl.reciprocal(1.0 + e, approx=True) if EUP-bound.)
    sig = jnp.where(x >= 0.0, 1.0, e) / (1.0 + e)
    dice_t = (t == 1.0).astype(jnp.float32)

    if seg_mask is not None:
        m = seg_mask.astype(jnp.float32)
        bce = bce * m
        sig = sig * m
        dice_t = dice_t * m

    out_ref[0, 0] = jnp.sum(bce)
    out_ref[0, 1] = jnp.sum(sig)
    out_ref[0, 2] = jnp.sum(dice_t)
    out_ref[0, 3] = jnp.sum(sig * dice_t)

    # --- vector channels: squared error --------------------------------------
    if is_vectors:
        d = x - t
        out_ref[0, 4] = jnp.sum(d * d * vec_mask.astype(jnp.float32))
    else:
        out_ref[0, 4] = jnp.float32(0.0)
    for k in range(5, _N_OUT):
        out_ref[0, k] = jnp.float32(0.0)


def _choose_tiles(n_rows, n_cols, itemsize, target_bytes):
    """Pick (tile_r, tile_c) : last dims are multiples of (8, 128) or full."""
    row_bytes = n_cols * itemsize
    if row_bytes >= target_bytes:
        # One (b, c) plane is already a big tile: few rows, 128-aligned columns.
        tile_r = n_rows if n_rows < 8 else 8
        cols = max(128, (target_bytes // (tile_r * itemsize)) // 128 * 128)
        tile_c = n_cols if cols >= n_cols else cols
    else:
        tile_c = n_cols
        rows = max(8, (target_bytes // row_bytes) // 8 * 8)
        tile_r = n_rows if rows >= n_rows else rows
    return tile_r, tile_c


def _partial_sums(outputs, targets, is_vectors, target_block_bytes):
    B, C, H, W = outputs.shape
    N, M = B * C, H * W
    # Free row-major views: one row per (b, c) channel plane, lane axis = H*W.
    x2 = outputs.reshape(N, M)
    t2 = targets.reshape(N, M)

    itemsize = max(jnp.dtype(outputs.dtype).itemsize, jnp.dtype(targets.dtype).itemsize)
    tile_r, tile_c = _choose_tiles(N, M, itemsize, target_block_bytes)
    nbr = pl.cdiv(N, tile_r)
    nbc = pl.cdiv(M, tile_c)
    ragged_r = (N % tile_r) != 0
    ragged_c = (M % tile_c) != 0

    kernel = functools.partial(
        _partials_kernel, tile_r=tile_r, tile_c=tile_c, n_rows=N, n_cols=M,
        n_channels=C, is_vectors=is_vectors, ragged_r=ragged_r, ragged_c=ragged_c)

    in_spec = pl.BlockSpec((tile_r, tile_c), lambda i, j: (i, j))
    partials = pl.pallas_call(
        kernel,
        out_shape=jax.ShapeDtypeStruct((nbr * nbc, _N_OUT), jnp.float32),
        grid_spec=pltpu.PrefetchScalarGridSpec(
            num_scalar_prefetch=0,
            grid=(nbr, nbc),
            in_specs=[in_spec, in_spec],
            out_specs=pl.BlockSpec(
                (1, _N_OUT), lambda i, j: (i * nbc + j, 0),
                memory_space=pltpu.MemorySpace.SMEM),
        ),
        compiler_params=pltpu.CompilerParams(
            # Each step writes its own partial row -> both axes are safely
            # parallel (v7x dual-TensorCore split; no-op on v5e/v6e).
            dimension_semantics=("parallel", "parallel"),
            vmem_limit_bytes=32 * 1024 * 1024,
        ),
    )(x2, t2)
    # Tiny tree reduction over per-block partials (also avoids the long
    # sequential f32 accumulation chain of the previous version).
    return jnp.sum(partials, axis=0)


@functools.partial(
    jax.jit,
    static_argnames=("bce_weight", "dice_weight", "is_vectors", "block_bytes"),
)
def _av_dice_loss(outputs, targets, bce_weight, dice_weight, is_vectors,
                  block_bytes=_TARGET_BLOCK_BYTES):
    B, C, H, W = outputs.shape
    eps = jnp.float32(1e-10)

    sums = _partial_sums(outputs, targets, is_vectors, block_bytes)

    # NOTE: is_vectors=True assumes C >= 3 (same implicit assumption as the
    # PyTorch module); C == 2 would leave zero segmentation elements.
    n_seg_channels = (C - 2) if is_vectors else C
    n_seg = B * n_seg_channels * H * W

    bce_mean = sums[0] / jnp.float32(n_seg)
    intersection = sums[3] + eps
    union = sums[1] + sums[2] + eps

    loss = bce_mean * jnp.float32(bce_weight)
    loss = loss + (1.0 - jnp.log(2.0 * intersection / union)) * jnp.float32(dice_weight)
    if is_vectors:
        n_vec = B * 2 * H * W
        loss = loss + sums[4] / jnp.float32(n_vec)
    return loss


class AVDiceLossPallas:
    """Pallas/JAX port of src/Loss.py:AVDiceLoss forward."""

    def __init__(self, bce_weight=1, dice_weight=1, is_vectors=False):
        self.bce_weight = bce_weight
        self.dice_weight = dice_weight
        self.is_vectors = is_vectors

    def __call__(self, outputs, targets):
        return _av_dice_loss(
            outputs,
            targets,
            bce_weight=self.bce_weight,
            dice_weight=self.dice_weight,
            is_vectors=self.is_vectors,
        )


def _reference_loss(outputs, targets, bce_weight=1, dice_weight=1, is_vectors=False):
    """Pure-JAX reference mirroring the PyTorch module (for correctness check)."""
    eps = 1e-10
    vector_loss = 0.0
    if is_vectors:
        ov, tv = outputs[:, -2:], targets[:, -2:]
        outputs, targets = outputs[:, :-2], targets[:, :-2]
        vector_loss = jnp.mean((ov - tv) ** 2)
    x, t = outputs.astype(jnp.float32), targets.astype(jnp.float32)
    bce = jnp.mean(jnp.maximum(x, 0.0) - x * t + jnp.log1p(jnp.exp(-jnp.abs(x))))
    dice_t = (t == 1.0).astype(jnp.float32)
    sig = jax.nn.sigmoid(x)
    inter = jnp.sum(sig * dice_t) + eps
    union = jnp.sum(sig) + jnp.sum(dice_t) + eps
    loss = bce * bce_weight + (1.0 - jnp.log(2.0 * inter / union)) * dice_weight
    if is_vectors:
        loss = loss + vector_loss
    return loss


if __name__ == "__main__":
    key = jax.random.PRNGKey(0)
    k1, k2, k3, k4 = jax.random.split(key, 4)

    # --- canonical small shapes (single fat block, no masking) --------------
    B, C, H, W = 2, 4, 16, 16
    outputs = jax.random.normal(k1, (B, C, H, W), dtype=jnp.float32)
    targets = jax.random.bernoulli(k2, 0.5, (B, C, H, W)).astype(jnp.float32)

    loss_fn = AVDiceLossPallas(bce_weight=1, dice_weight=1, is_vectors=False)
    loss = jax.block_until_ready(loss_fn(outputs, targets))
    ref = _reference_loss(outputs, targets, is_vectors=False)
    assert jnp.allclose(loss, ref, rtol=1e-5, atol=1e-5), (loss, ref)

    loss_fn_v = AVDiceLossPallas(bce_weight=1, dice_weight=1, is_vectors=True)
    loss_v = jax.block_until_ready(loss_fn_v(outputs, targets))
    ref_v = _reference_loss(outputs, targets, is_vectors=True)
    assert jnp.allclose(loss_v, ref_v, rtol=1e-5, atol=1e-5), (loss_v, ref_v)

    # --- multi-block / ragged-edge tiling path (tiny block budget forces
    #     row AND column tiling + the iota masks) ----------------------------
    B2, C2, H2, W2 = 2, 5, 30, 30
    out2 = jax.random.normal(k3, (B2, C2, H2, W2), dtype=jnp.float32)
    tgt2 = jax.random.bernoulli(k4, 0.5, (B2, C2, H2, W2)).astype(jnp.float32)
    for is_vec in (False, True):
        got = jax.block_until_ready(
            _av_dice_loss(out2, tgt2, bce_weight=1, dice_weight=1,
                          is_vectors=is_vec, block_bytes=2048))
        want = _reference_loss(out2, tgt2, is_vectors=is_vec)
        assert jnp.allclose(got, want, rtol=1e-5, atol=1e-5), (is_vec, got, want)

    print("KERNEL_OK")
</pallas_src>

<mosaic_0001>
module attributes {stable_mosaic.version = 11 : i64} {
  func.func @_partials_kernel(%arg0: i32, %arg1: i32, %arg2: memref<8x256xf32, #tpu.memory_space<vmem>>, %arg3: memref<8x256xf32, #tpu.memory_space<vmem>>, %arg4: memref<1x8xf32, #tpu.memory_space<smem>>) attributes {dimension_semantics = [#tpu.dimension_semantics<parallel>, #tpu.dimension_semantics<parallel>], iteration_bounds = array<i64: 1, 1>, scalar_prefetch = 0 : i64, scratch_operands = 0 : i64, tpu.core_type = #tpu.core_type<tc>, window_params = [{transform_indices = @transform_0, window_bounds = array<i64: 8, 256>}, {transform_indices = @transform_1, window_bounds = array<i64: 8, 256>}, {transform_indices = @transform_2, window_bounds = array<i64: 1, 8>}]} {
    %c0 = arith.constant 0 : index
    %c0_0 = arith.constant 0 : index
    %0 = vector.load %arg2[%c0, %c0_0] : memref<8x256xf32, #tpu.memory_space<vmem>>, vector<8x256xf32>
    %c0_1 = arith.constant 0 : index
    %c0_2 = arith.constant 0 : index
    %1 = vector.load %arg3[%c0_1, %c0_2] : memref<8x256xf32, #tpu.memory_space<vmem>>, vector<8x256xf32>
    %2 = math.absf %0 : vector<8x256xf32>
    %cst = arith.constant 0.000000e+00 : f32
    %3 = vector.broadcast %cst : f32 to vector<8x256xf32>
    %4 = arith.subf %3, %2 : vector<8x256xf32>
    %5 = math.exp %4 : vector<8x256xf32>
    %cst_3 = arith.constant 0.000000e+00 : f32
    %6 = vector.broadcast %cst_3 : f32 to vector<8x256xf32>
    %7 = arith.maximumf %0, %6 : vector<8x256xf32>
    %8 = arith.mulf %0, %1 : vector<8x256xf32>
    %9 = arith.subf %7, %8 : vector<8x256xf32>
    %10 = math.log1p %5 : vector<8x256xf32>
    %11 = arith.addf %9, %10 : vector<8x256xf32>
    %cst_4 = arith.constant 0.000000e+00 : f32
    %12 = vector.broadcast %cst_4 : f32 to vector<8x256xf32>
    %13 = arith.cmpf oge, %0, %12 : vector<8x256xf32>
    %cst_5 = arith.constant 1.000000e+00 : f32
    %14 = vector.broadcast %cst_5 : f32 to vector<8x256xf32>
    %15 = arith.select %13, %14, %5 : vector<8x256xi1>, vector<8x256xf32>
    %cst_6 = arith.constant 1.000000e+00 : f32
    %16 = vector.broadcast %cst_6 : f32 to vector<8x256xf32>
    %17 = arith.addf %16, %5 : vector<8x256xf32>
    %18 = arith.divf %15, %17 : vector<8x256xf32>
    %cst_7 = arith.constant 1.000000e+00 : f32
    %19 = vector.broadcast %cst_7 : f32 to vector<8x256xf32>
    %20 = arith.cmpf oeq, %1, %19 : vector<8x256xf32>
    %21 = arith.extui %20 : vector<8x256xi1> to vector<8x256xi32>
    %22 = arith.sitofp %21 : vector<8x256xi32> to vector<8x256xf32>
    %23 = vector.shape_cast %11 : vector<8x256xf32> to vector<1x8x256xf32>
    %cst_8 = arith.constant dense<0.000000e+00> : vector<1xf32>
    %24 = vector.multi_reduction <add>, %23, %cst_8 [1, 2] : vector<1x8x256xf32> to vector<1xf32>
    %25 = vector.shape_cast %24 : vector<1xf32> to vector<1x1x1xf32>
    %26 = vector.extract %25[0, 0, 0] : f32 from vector<1x1x1xf32>
    %c0_9 = arith.constant 0 : index
    %c0_10 = arith.constant 0 : index
    %27 = memref.load %arg4[%c0_9, %c0_10] : memref<1x8xf32, #tpu.memory_space<smem>>
    memref.store %26, %arg4[%c0_9, %c0_10] : memref<1x8xf32, #tpu.memory_space<smem>>
    %28 = vector.shape_cast %18 : vector<8x256xf32> to vector<1x8x256xf32>
    %cst_11 = arith.constant dense<0.000000e+00> : vector<1xf32>
    %29 = vector.multi_reduction <add>, %28, %cst_11 [1, 2] : vector<1x8x256xf32> to vector<1xf32>
    %30 = vector.shape_cast %29 : vector<1xf32> to vector<1x1x1xf32>
    %31 = vector.extract %30[0, 0, 0] : f32 from vector<1x1x1xf32>
    %c0_12 = arith.constant 0 : index
    %c1 = arith.constant 1 : index
    %32 = memref.load %arg4[%c0_12, %c1] : memref<1x8xf32, #tpu.memory_space<smem>>
    memref.store %31, %arg4[%c0_12, %c1] : memref<1x8xf32, #tpu.memory_space<smem>>
    %33 = vector.shape_cast %22 : vector<8x256xf32> to vector<1x8x256xf32>
    %cst_13 = arith.constant dense<0.000000e+00> : vector<1xf32>
    %34 = vector.multi_reduction <add>, %33, %cst_13 [1, 2] : vector<1x8x256xf32> to vector<1xf32>
    %35 = vector.shape_cast %34 : vector<1xf32> to vector<1x1x1xf32>
    %36 = vector.extract %35[0, 0, 0] : f32 from vector<1x1x1xf32>
    %c0_14 = arith.constant 0 : index
    %c2 = arith.constant 2 : index
    %37 = memref.load %arg4[%c0_14, %c2] : memref<1x8xf32, #tpu.memory_space<smem>>
    memref.store %36, %arg4[%c0_14, %c2] : memref<1x8xf32, #tpu.memory_space<smem>>
    %38 = arith.mulf %18, %22 : vector<8x256xf32>
    %39 = vector.shape_cast %38 : vector<8x256xf32> to vector<1x8x256xf32>
    %cst_15 = arith.constant dense<0.000000e+00> : vector<1xf32>
    %40 = vector.multi_reduction <add>, %39, %cst_15 [1, 2] : vector<1x8x256xf32> to vector<1xf32>
    %41 = vector.shape_cast %40 : vector<1xf32> to vector<1x1x1xf32>
    %42 = vector.extract %41[0, 0, 0] : f32 from vector<1x1x1xf32>
    %c0_16 = arith.constant 0 : index
    %c3 = arith.constant 3 : index
    %43 = memref.load %arg4[%c0_16, %c3] : memref<1x8xf32, #tpu.memory_space<smem>>
    memref.store %42, %arg4[%c0_16, %c3] : memref<1x8xf32, #tpu.memory_space<smem>>
    %cst_17 = arith.constant 0.000000e+00 : f32
    %c0_18 = arith.constant 0 : index
    %c4 = arith.constant 4 : index
    %44 = memref.load %arg4[%c0_18, %c4] : memref<1x8xf32, #tpu.memory_space<smem>>
    memref.store %cst_17, %arg4[%c0_18, %c4] : memref<1x8xf32, #tpu.memory_space<smem>>
    %cst_19 = arith.constant 0.000000e+00 : f32
    %c0_20 = arith.constant 0 : index
    %c5 = arith.constant 5 : index
    %45 = memref.load %arg4[%c0_20, %c5] : memref<1x8xf32, #tpu.memory_space<smem>>
    memref.store %cst_19, %arg4[%c0_20, %c5] : memref<1x8xf32, #tpu.memory_space<smem>>
    %cst_21 = arith.constant 0.000000e+00 : f32
    %c0_22 = arith.constant 0 : index
    %c6 = arith.constant 6 : index
    %46 = memref.load %arg4[%c0_22, %c6] : memref<1x8xf32, #tpu.memory_space<smem>>
    memref.store %cst_21, %arg4[%c0_22, %c6] : memref<1x8xf32, #tpu.memory_space<smem>>
    %cst_23 = arith.constant 0.000000e+00 : f32
    %c0_24 = arith.constant 0 : index
    %c7 = arith.constant 7 : index
    %47 = memref.load %arg4[%c0_24, %c7] : memref<1x8xf32, #tpu.memory_space<smem>>
    memref.store %cst_23, %arg4[%c0_24, %c7] : memref<1x8xf32, #tpu.memory_space<smem>>
    return
  }
  func.func @transform_0(%arg0: i32, %arg1: i32) -> (i32, i32) {
    %c0_i32 = arith.constant 0 : i32
    return %arg0, %arg1 : i32, i32
  }
  func.func @transform_1(%arg0: i32, %arg1: i32) -> (i32, i32) {
    %c0_i32 = arith.constant 0 : i32
    return %arg0, %arg1 : i32, i32
  }
  func.func @transform_2(%arg0: i32, %arg1: i32) -> (i32, i32) {
    %c1_i32 = arith.constant 1 : i32
    %0 = arith.muli %arg0, %c1_i32 : i32
    %1 = arith.addi %0, %arg1 : i32
    %c0_i32 = arith.constant 0 : i32
    %c0_i32_0 = arith.constant 0 : i32
    return %1, %c0_i32 : i32, i32
  }
}

</mosaic_0001>

<bundles_post_ra>
// kernel: _av_dice_loss.1
= control target key start
LH: loop header
LB: loop body
LE: loop exit
PB: predicated region body
PF: predicated region fallthrough
CT: control target
= control target key end

     0   :  { %v207_v5 = vmov 0.0   ;;  %s282_s0 = inlined_call_operand.vmem [shape: f32[8,256], index: 0, kind: input, shape index: {}]   ;;  %s283_s1 = inlined_call_operand.vmem [shape: f32[8,256], index: 1, kind: input, shape index: {}]   ;;  %s284_s2 = inlined_call_operand.vmem [shape: f32[1,8], index: 2, kind: output, shape index: {}]  }
   0x1   :  { %v15_v0 = vld [vmem:[%s283_s1] sm:$0xff]  ;;  %v16_v1 = vld [vmem:[%s283_s1 + $0x8] sm:$0xff] }
   0x2   :  { %v234_v2 = vld [vmem:[%s282_s0] sm:$0xff]  ;;  %vm87_vm0 = vcmp.eq.f32.partialorder %v15_v0, 1.0  ;;  %vm88_vm1 = vcmp.eq.f32.partialorder %v16_v1, 1.0  ;;  %v239_v3 = vld [vmem:[%s282_s0 + $0x8] sm:$0xff] }
   0x3   :  { %v17_v4 = vand.u32 2147483647, %v234_v2  ;;  %v242_v6 = vsel %vm87_vm0, 1.0, %v207_v5  ;;  %v244_v7 = vsel %vm88_vm1, 1.0, %v207_v5  ;;  %v18_v8 = vand.u32 2147483647, %v239_v3 }
   0x4   :  { %7 = vsyncpa [#allocation3], 0  ;;  %v117_v9 = vadd.f32 %v244_v7, %v242_v6  ;;  %v27_v20 = vmul.f32 %v15_v0, %v234_v2  ;;  %v28_v21 = vmul.f32 %v16_v1, %v239_v3  ;;  %v25_v22 = vmax.f32 %v234_v2, 0.0  ;;  %s208_s0 = smov 0.0   ;;  %s158_s19 = sshll.u32 %s284_s2, 4  ;;  %s159_s19 = int_to_ptr.vmem [resolvable:$true] %s158_s19 }
   0x5   :  { %v19_v10 = vsub.f32 0.0, %v17_v4  ;;  %v20_v11 = vsub.f32 0.0, %v18_v8  ;;  %v26_v23 = vmax.f32 %v239_v3, 0.0  ;;  %vm51_vm8 = vcmp.ge.f32.partialorder %v234_v2, 0.0  ;;  %144 = sst [smem:[#allocation2 + $0x4]] %s208_s0  ;;  %s209_s23 = smov [#allocation2]  }
   0x6   :  { %118 = vadd.xlane.f32.xlu1 %v117_v9  ;;  %v29_v30 = vsub.f32 %v25_v22, %v27_v20  ;;  %vm52_vm9 = vcmp.ge.f32.partialorder %v239_v3, 0.0  ;;  %146 = sst [smem:[#allocation2 + $0x5]] %s208_s0 }
   0x7   :  { %v21_v12 = vmul.f32 1.442695, %v19_v10  ;;  %v23_v13 = vmul.f32 1.442695, %v20_v11  ;;  %v30_v31 = vsub.f32 %v26_v23, %v28_v21  ;;  %148 = sst [smem:[#allocation2 + $0x6]] %s208_s0 }
   0x8   :  { %150 = sst [smem:[#allocation2 + $0x7]] %s208_s0 }
   0x9   :  { %181 = vpow2.f32 %v21_v12 }
   0xa   :  { %183 = vpow2.f32 %v23_v13 }
   0xf   :  { %v182_v14 = vpop.eup %181 }
  0x10   :  { %v184_v15 = vpop.eup %183  ;;  %v31_v16 = vadd.f32 1.0, %v182_v14  ;;  %v34_v18 = vmul.f32 -0.5, %v182_v14  ;;  %v37_v25 = vand.u32 2147483647, %v182_v14  ;;  %v53_v58 = vsel %vm51_vm8, 1.0, %v182_v14 }
  0x11   :  { %v40_v17 = vadd.f32 1.0, %v184_v15  ;;  %v43_v19 = vmul.f32 -0.5, %v184_v15  ;;  %v46_v27 = vand.u32 2147483647, %v184_v15  ;;  %v54_v60 = vsel %vm52_vm9, 1.0, %v184_v15 }
  0x12   :  { %185 = vrcp.f32 %v31_v16  ;;  %v35_v24 = vadd.f32 1.0, %v34_v18  ;;  %vm62_vm2 = vweird.f32 %v31_v16  ;;  %v66_v29 = vand.u32 2147483647, %v31_v16 }
  0x13   :  { %187 = vrcp.f32 %v40_v17  ;;  %v44_v26 = vadd.f32 1.0, %v43_v19  ;;  %v68_v34 = vand.u32 2147483648, %v31_v16  ;;  %vm77_vm3 = vweird.f32 %v40_v17 }
  0x14   :  { %189 = vlog2.f32 %v31_v16  ;;  %v36_v35 = vmul.f32 %v182_v14, %v35_v24  ;;  %v83_v38 = vand.u32 2147483648, %v40_v17  ;;  %vm253_vm4 = vcmp.lt.f32.partialorder %v37_v25, 0.0004427343 }
  0x15   :  { %191 = vlog2.f32 %v40_v17  ;;  %v45_v40 = vmul.f32 %v184_v15, %v44_v26  ;;  %vm257_vm6 = vcmp.lt.f32.partialorder %v46_v27, 0.0004427343  ;;  %v81_v46 = vand.u32 2147483647, %v40_v17 }
  0x16   :  { %v69_v51 = vor.u32 1.1754944e-38, %v68_v34  ;;  %vm67_vm11 = vcmp.eq.f32.partialorder %v66_v29, 8.507059e+37  ;;  %v84_v56 = vor.u32 1.1754944e-38, %v83_v38 }
  0x17   :  { %vm82_vm13 = vcmp.eq.f32.partialorder %v81_v46, 8.507059e+37 }
  0x18   :  { %v186_v28 = vpop.eup %185 }
  0x19   :  { %v188_v32 = vpop.eup %187  ;;  %v58_v33 = vmul.f32 %v186_v28, %v31_v16  ;;  %vm63_vm5 = vweird.f32 %v186_v28 }
  0x1a   :  { %v190_v36 = vpop.eup %189  ;;  %v73_v37 = vmul.f32 %v188_v32, %v40_v17  ;;  %vm78_vm7 = vweird.f32 %v188_v32  ;;  %vm266_vm10 = vmor %vm62_vm2, %vm63_vm5 }
  0x1b   :  { %v192_v41 = vpop.eup %191  ;;  %v59_v42 = vsub.f32 1.0, %v58_v33  ;;  %v33_v43 = vmul.f32 0.6931472, %v190_v36  ;;  %vm79_vm12 = vmor %vm77_vm3, %vm78_vm7 }
  0x1c   :  { %v74_v45 = vsub.f32 1.0, %v73_v37  ;;  %v42_v47 = vmul.f32 0.6931472, %v192_v41 }
  0x1d   :  { %v60_v48 = vmul.f32 %v186_v28, %v59_v42  ;;  %v39_v49 = vsel %vm253_vm4, %v36_v35, %v33_v43 }
  0x1e   :  { %v75_v52 = vmul.f32 %v188_v32, %v74_v45  ;;  %v48_v53 = vsel %vm257_vm6, %v45_v40, %v42_v47  ;;  %v49_v54 = vadd.f32 %v39_v49, %v29_v30 }
  0x1f   :  { %v61_v55 = vadd.f32 %v186_v28, %v60_v48  ;;  %v50_v57 = vadd.f32 %v48_v53, %v30_v31 }
  0x20   :  { %v76_v59 = vadd.f32 %v188_v32, %v75_v52 }
  0x21   :  { %v65_v61 = vsel %vm266_vm10, %v186_v28, %v61_v55  ;;  %v93_v62 = vadd.f32 %v50_v57, %v49_v54 }
  0x22   :  { %v70_v63 = vsel %vm67_vm11, %v69_v51, %v65_v61  ;;  %v80_v0 = vsel %vm79_vm12, %v188_v32, %v76_v59 }
  0x23   :  { %v71_v1 = vmul.f32 %v70_v63, %v53_v58  ;;  %v85_v2 = vsel %vm82_vm13, %v84_v56, %v80_v0  ;;  %94 = vadd.xlane.f32.xlu0 %v93_v62 }
  0x24   :  { %v86_v4 = vmul.f32 %v85_v2, %v54_v60 }
  0x25   :  { %v129_v5 = vmul.f32 %v242_v6, %v71_v1 }
  0x26   :  { %v130_v8 = vmul.f32 %v244_v7, %v86_v4  ;;  %v105_v9 = vadd.f32 %v86_v4, %v71_v1 }
  0x28   :  { %v131_v10 = vadd.f32 %v130_v8, %v129_v5 }
  0x2a   :  { %132 = vadd.xlane.f32.xlu1 %v131_v10 }
  0x2b   :  { %106 = vadd.xlane.f32.xlu0 %v105_v9 }
  0x79   :  { %v119_v3 = vpop.xlane.xlu1 %118 }
  0x7a   :  { %v120_v11 = vrot.slane %v119_v3, 4 }
  0x7c   :  { %v121_v15 = vadd.f32 %v120_v11, %v119_v3 }
  0x7e   :  { %v122_v18 = vrot.slane %v121_v15, 2 }
  0x80   :  { %v123_v26 = vadd.f32 %v122_v18, %v121_v15 }
  0x82   :  { %v124_v30 = vrot.slane %v123_v26, 1 }
  0x84   :  { %v125_v35 = vadd.f32 %v124_v30, %v123_v26 }
  0x96   :  { %v95_v12 = vpop.xlane.xlu0 %94 }
  0x97   :  { %v96_v13 = vrot.slane %v95_v12, 4 }
  0x99   :  { %v97_v14 = vadd.f32 %v96_v13, %v95_v12 }
  0x9b   :  { %v98_v16 = vrot.slane %v97_v14, 2 }
  0x9d   :  { %v133_v17 = vpop.xlane.xlu1 %132  ;;  %v99_v6 = vadd.f32 %v98_v16, %v97_v14 }
  0x9e   :  { %v107_v7 = vpop.xlane.xlu0 %106  ;;  %v134_v19 = vrot.slane %v133_v17, 4 }
  0x9f   :  { %v108_v20 = vrot.slane %v107_v7, 4  ;;  %v100_v21 = vrot.slane %v99_v6, 1 }
  0xa0   :  { %v135_v22 = vadd.f32 %v134_v19, %v133_v17 }
  0xa1   :  { %v109_v23 = vadd.f32 %v108_v20, %v107_v7  ;;  %v101_v24 = vadd.f32 %v100_v21, %v99_v6 }
  0xa2   :  { %v136_v25 = vrot.slane %v135_v22, 2 }
  0xa3   :  { %v110_v27 = vrot.slane %v109_v23, 2  ;;  %170 = vpush %v101_v24 }
  0xa4   :  { %v137_v28 = vadd.f32 %v136_v25, %v135_v22 }
  0xa5   :  { %v111_v29 = vadd.f32 %v110_v27, %v109_v23 }
  0xa6   :  { %v138_v31 = vrot.slane %v137_v28, 1 }
  0xa7   :  { %v112_v32 = vrot.slane %v111_v29, 1 }
  0xa8   :  { %v139_v34 = vadd.f32 %v138_v31, %v137_v28 }
  0xa9   :  { %v113_v33 = vadd.f32 %v112_v32, %v111_v29 }
  0xab   :  { %172 = vpush %v113_v33 }
  0xac   :  { %174 = vpush %v125_v35 }
  0xad   :  { %176 = vpush %v139_v34 }
  0xd4   :  { %s171_s1 = spop %170 }
  0xd5   :  { %104 = sst [smem:[#allocation2]] %s171_s1 }
  0xdc   :  { %s173_s20 = spop %172 }
  0xdd   :  { %116 = sst [smem:[#allocation2 + $0x1]] %s173_s20  ;;  %s175_s21 = spop %174 }
  0xde   :  { %128 = sst [smem:[#allocation2 + $0x2]] %s175_s21  ;;  %s177_s22 = spop %176 }
  0xdf   :  { %142 = sst [smem:[#allocation2 + $0x3]] %s177_s22 }
  0xe0   :  { %161 = dma.smem_to_vmem %s209_s23, 16, %s159_s19, [#allocation3]  }
  0xe1   :  { %205 = dma.done.wait [#allocation3], 16  }
  0xe2   :  { %206 = vsyncadd [#allocation3], 4294967280 }
  0xe3   :  { %166 = sfence }
  0xe4   :  { %167 = vsyncpa [#allocation3], 1 }

</bundles_post_ra>
